<compile_context>
chip_gen: v6e
topology: v6e:2x2x1
jax: 0.10.0
libtpu: 0.0.40
codegen_flags: <defaults>
</compile_context>

<pallas_src>
import math
from functools import partial

import jax
import jax.numpy as jnp
from jax.experimental import pallas as pl
from jax.experimental.pallas import tpu as pltpu


# Packed sublane minimum per element size (bytes -> rows) to avoid masked
# packed stores.
_SUBLANE_MIN = {4: 8, 2: 16, 1: 32}


def _round_up(v, m):
    return ((v + m - 1) // m) * m


def _device_kind():
    try:
        return jax.devices()[0].device_kind.lower()
    except Exception:
        return ""


def _block_bytes():
    kind = _device_kind()
    # v5e: ~0.8 TB/s HBM and a tight 16 MiB scoped-VMEM default -> 2 MiB blocks
    # already amortize the per-step overhead to ~10%.
    if "v5e" in kind or "v5 lite" in kind or "v5lite" in kind:
        return 2 << 20
    # v6e / v7x: 4 MiB blocks cut the ~0.35 us per-step overhead to <10% at
    # 1.4-3.2 TB/s HBM; double-buffered footprint (~26 MiB) still fits the
    # 32 MiB scoped VMEM default.
    return 4 << 20


def _tensorcores_per_chip():
    kind = _device_kind()
    return 2 if ("v7" in kind or "v4" in kind or "v3" in kind) else 1


# ----------------------------- kernels --------------------------------------

def _mul_vec_kernel(x_ref, f_ref, o_ref):
    # f_ref is a (1, tile_feat) row in the compute dtype; the VPU broadcasts it
    # along sublanes for free.
    o_ref[...] = (x_ref[...] * f_ref[...]).astype(o_ref.dtype)


def _mul_vec_bias_kernel(x_ref, fb_ref, o_ref):
    # fb_ref packs factor (row 0) and bias (row 1) into one (2, tile_feat)
    # block -> one param DMA descriptor per grid step instead of two.
    # addcmul(bias, x, factor) = bias + x * factor
    o_ref[...] = (fb_ref[1:2, :] + x_ref[...] * fb_ref[0:1, :]).astype(o_ref.dtype)


def _mul_smem_kernel(x_ref, f_ref, o_ref):
    # f_ref is a (1,) float32 scalar in SMEM; compute in f32, cast the result.
    o_ref[...] = (x_ref[...].astype(jnp.float32) * f_ref[0]).astype(o_ref.dtype)


def _mul_smem_bias_kernel(x_ref, f_ref, b_ref, o_ref):
    o_ref[...] = (b_ref[0] + x_ref[...].astype(jnp.float32) * f_ref[0]).astype(
        o_ref.dtype)


# ----------------------------- tiling helpers --------------------------------

def _choose_fold(n_rows, feat):
    """Pick k >= 1 with k | n_rows and (k*feat) % 128 == 0, prefer k*feat >= 512."""
    if feat % 128 == 0 and feat >= 512:
        return 1
    k0 = 128 // math.gcd(feat, 128)          # smallest k making k*feat % 128 == 0
    best = 1 if feat % 128 == 0 else None
    m = 1
    while True:
        k = m * k0
        if k > n_rows or k * feat > 8192:
            break
        if n_rows % k == 0:
            best = k
            if k * feat >= 512:
                break
        m += 1
    return best if best is not None else 1


def _tile_plan(work_rows, work_feat, itemsize, block_bytes, tcs):
    sublane = _SUBLANE_MIN.get(itemsize, 8)
    # Feature-axis tile: full width unless extremely wide.
    max_feat = max(128, block_bytes // (sublane * itemsize))
    tile_feat = work_feat if work_feat <= max_feat else (max_feat // 128) * 128
    # Row-axis tile sized by bytes, rounded to the packed sublane minimum.
    rows_budget = max(1, block_bytes // (tile_feat * itemsize))
    if work_rows < sublane:
        tile_rows = work_rows                      # full-extent (allowed), tiny anyway
    else:
        tile_rows = _round_up(min(rows_budget, work_rows), sublane)
    grid_feat = pl.cdiv(work_feat, tile_feat)
    grid_rows = pl.cdiv(work_rows, tile_rows)
    # Only force a >= 2-block grid on multi-TensorCore chips (v7x); on 1-TC
    # chips splitting just shrinks the block and adds a grid step.
    if tcs >= 2 and grid_feat * grid_rows < 2 and work_rows > sublane:
        tile_rows = max(sublane, _round_up(pl.cdiv(work_rows, 2), sublane))
        grid_rows = pl.cdiv(work_rows, tile_rows)
    return tile_rows, tile_feat, grid_rows, grid_feat


def _call_params(tile_rows, tile_feat, in_itemsize, out_itemsize, total,
                 has_bias, param_bytes):
    block_io = tile_rows * tile_feat * (in_itemsize + out_itemsize)
    vmem_limit = int(min(max(3 * block_io + (2 << 20), 16 << 20), 32 << 20))
    cparams = pltpu.CompilerParams(
        dimension_semantics=("parallel", "parallel"),
        vmem_limit_bytes=vmem_limit,
    )
    ce = pl.CostEstimate(
        flops=(2 if has_bias else 1) * total,
        transcendentals=0,
        bytes_accessed=total * (in_itemsize + out_itemsize) + param_bytes,
    )
    return cparams, ce


# ----------------------------- wrapper ----------------------------------------

@partial(jax.jit, static_argnames=("small_bypass_bytes",))
def mul_forward(x, factor, bias=None, *, small_bypass_bytes=1 << 20):
    """Forward pass of the Mul module with a Pallas TPU kernel.

    Args:
      x: array of shape [*, feat_size].
      factor: array of shape [feat_size] or [1].
      bias: optional array of shape [feat_size] or [1].
      small_bypass_bytes: inputs smaller than this (in bytes) use plain XLA.

    Returns:
      Array of shape x.shape with dtype promote(x, factor[, bias]) (torch
      type-promotion semantics of mul/addcmul).
    """
    orig_shape = x.shape
    feat = orig_shape[-1]
    n_rows = int(math.prod(orig_shape[:-1]))
    total = n_rows * feat

    # torch type promotion: out dtype = promote(x, factor[, bias]).
    out_dtype = jnp.promote_types(x.dtype, factor.dtype)
    if bias is not None:
        out_dtype = jnp.promote_types(out_dtype, bias.dtype)

    in_itemsize = jnp.dtype(x.dtype).itemsize
    out_itemsize = jnp.dtype(out_dtype).itemsize

    # Small-input bypass: fixed pallas_call / grid-step overhead dominates for
    # tiny tensors; XLA's fused elementwise is at least as fast there.
    if total * in_itemsize < small_bypass_bytes:
        out = x.astype(out_dtype) * factor.astype(out_dtype).reshape(-1)
        if bias is not None:
            out = bias.astype(out_dtype).reshape(-1) + out
        return out

    block_bytes = _block_bytes()
    tcs = _tensorcores_per_chip()
    scalar_params = (factor.size == 1) and (bias is None or bias.size == 1)

    if scalar_params:
        # -------- scalar factor / bias: SMEM params + lane-dense flatten -----
        # Flatten everything into a (total // L, L) slab with L a wide multiple
        # of 128 -> unmasked full-lane stores regardless of feat.
        lane_w = next((c for c in (2048, 1024, 512, 256, 128) if total % c == 0),
                      None)
        if lane_w is not None:
            work_rows, work_feat = total // lane_w, lane_w
        else:
            # TODO(synk): totals not divisible by 128 keep the feat layout and
            # may use masked partial stores on the last lane block.
            work_rows, work_feat = n_rows, feat
        x2d = x.reshape(work_rows, work_feat)

        tile_rows, tile_feat, grid_rows, grid_feat = _tile_plan(
            work_rows, work_feat, in_itemsize, block_bytes, tcs)

        # Feat axis outer, rows inner (param refs are SMEM so order is moot,
        # kept consistent with the vector path).
        x_spec = pl.BlockSpec((tile_rows, tile_feat), lambda j, i: (i, j))
        o_spec = pl.BlockSpec((tile_rows, tile_feat), lambda j, i: (i, j))
        smem_spec = pl.BlockSpec(memory_space=pltpu.MemorySpace.SMEM)

        cparams, ce = _call_params(tile_rows, tile_feat, in_itemsize,
                                   out_itemsize, total, bias is not None, 8)

        f_s = factor.reshape(1).astype(jnp.float32)
        if bias is not None:
            b_s = bias.reshape(1).astype(jnp.float32)
            out2d = pl.pallas_call(
                _mul_smem_bias_kernel,
                out_shape=jax.ShapeDtypeStruct((work_rows, work_feat), out_dtype),
                grid=(grid_feat, grid_rows),
                in_specs=[x_spec, smem_spec, smem_spec],
                out_specs=o_spec,
                compiler_params=cparams,
                cost_estimate=ce,
            )(x2d, f_s, b_s)
        else:
            out2d = pl.pallas_call(
                _mul_smem_kernel,
                out_shape=jax.ShapeDtypeStruct((work_rows, work_feat), out_dtype),
                grid=(grid_feat, grid_rows),
                in_specs=[x_spec, smem_spec],
                out_specs=o_spec,
                compiler_params=cparams,
                cost_estimate=ce,
            )(x2d, f_s)
    else:
        # -------- feature-dependent params: fold rows into lanes -------------
        k = _choose_fold(n_rows, feat)
        work_rows, work_feat = n_rows // k, feat * k
        x2d = x.reshape(work_rows, work_feat)

        # Params materialized once in the compute (promoted) dtype; tiled k
        # times so each folded lane chunk sees the right per-feature value.
        f_row = jnp.broadcast_to(factor.astype(out_dtype).reshape(-1), (feat,))
        if k > 1:
            f_row = jnp.tile(f_row, k)

        tile_rows, tile_feat, grid_rows, grid_feat = _tile_plan(
            work_rows, work_feat, in_itemsize, block_bytes, tcs)

        # Feat axis OUTER so the param block index (0, j) is constant across
        # the inner row loop (no per-step param re-fetch).
        x_spec = pl.BlockSpec((tile_rows, tile_feat), lambda j, i: (i, j))
        o_spec = pl.BlockSpec((tile_rows, tile_feat), lambda j, i: (i, j))

        if bias is not None:
            b_row = jnp.broadcast_to(bias.astype(out_dtype).reshape(-1), (feat,))
            if k > 1:
                b_row = jnp.tile(b_row, k)
            fb = jnp.stack([f_row, b_row], axis=0)             # (2, work_feat)
            param_bytes = 2 * work_feat * out_itemsize
            cparams, ce = _call_params(tile_rows, tile_feat, in_itemsize,
                                       out_itemsize, total, True, param_bytes)
            fb_spec = pl.BlockSpec((2, tile_feat), lambda j, i: (0, j))
            out2d = pl.pallas_call(
                _mul_vec_bias_kernel,
                out_shape=jax.ShapeDtypeStruct((work_rows, work_feat), out_dtype),
                grid=(grid_feat, grid_rows),
                in_specs=[x_spec, fb_spec],
                out_specs=o_spec,
                compiler_params=cparams,
                cost_estimate=ce,
            )(x2d, fb)
        else:
            f2d = f_row.reshape(1, work_feat)
            param_bytes = work_feat * out_itemsize
            cparams, ce = _call_params(tile_rows, tile_feat, in_itemsize,
                                       out_itemsize, total, False, param_bytes)
            p_spec = pl.BlockSpec((1, tile_feat), lambda j, i: (0, j))
            out2d = pl.pallas_call(
                _mul_vec_kernel,
                out_shape=jax.ShapeDtypeStruct((work_rows, work_feat), out_dtype),
                grid=(grid_feat, grid_rows),
                in_specs=[x_spec, p_spec],
                out_specs=o_spec,
                compiler_params=cparams,
                cost_estimate=ce,
            )(x2d, f2d)

    return out2d.reshape(orig_shape)


if __name__ == "__main__":
    key = jax.random.PRNGKey(0)

    # --- feat-dependent factor + bias, feat = 128 ---------------------------
    feat = 128
    factor = jnp.full((feat,), 1.5, dtype=jnp.float32)
    bias = jnp.full((feat,), 0.25, dtype=jnp.float32)
    x = jax.random.normal(key, (2, 8, feat), dtype=jnp.float32)
    out = jax.block_until_ready(mul_forward(x, factor, bias, small_bypass_bytes=0))
    ref = bias + x * factor
    assert out.shape == x.shape and out.dtype == ref.dtype
    assert jnp.allclose(out, ref, atol=1e-6, rtol=1e-6)

    # --- feat-dependent, feat NOT a multiple of 128 (row-folding path) ------
    feat2 = 96
    f2 = jax.random.normal(jax.random.PRNGKey(2), (feat2,), dtype=jnp.float32)
    b2 = jax.random.normal(jax.random.PRNGKey(3), (feat2,), dtype=jnp.float32)
    x2 = jax.random.normal(jax.random.PRNGKey(4), (2, 8, feat2), dtype=jnp.float32)
    out2 = jax.block_until_ready(mul_forward(x2, f2, b2, small_bypass_bytes=0))
    assert jnp.allclose(out2, b2 + x2 * f2, atol=1e-5, rtol=1e-5)

    # --- scalar factor (SMEM path, lane-dense flatten), no bias -------------
    f_s = jnp.array([0.5], dtype=jnp.float32)
    out3 = jax.block_until_ready(mul_forward(x, f_s, None, small_bypass_bytes=0))
    assert jnp.allclose(out3, x * f_s, atol=1e-6, rtol=1e-6)

    # --- scalar factor + scalar bias -----------------------------------------
    b_s = jnp.array([-0.75], dtype=jnp.float32)
    out4 = jax.block_until_ready(mul_forward(x, f_s, b_s, small_bypass_bytes=0))
    assert jnp.allclose(out4, b_s + x * f_s, atol=1e-6, rtol=1e-6)

    # --- bf16 input, f32 per-feature factor (torch promotion -> f32 out) ----
    xb = jax.random.normal(jax.random.PRNGKey(1), (4, 64, feat), dtype=jnp.bfloat16)
    fb = jnp.full((feat,), 2.0, dtype=jnp.float32)
    out5 = jax.block_until_ready(mul_forward(xb, fb, None, small_bypass_bytes=0))
    refb = xb.astype(jnp.float32) * fb
    assert out5.dtype == jnp.float32
    assert jnp.allclose(out5, refb, atol=1e-2, rtol=1e-2)

    # --- tiny input through the default small-input XLA bypass --------------
    out6 = jax.block_until_ready(mul_forward(x, factor, bias))
    assert jnp.allclose(out6, ref, atol=1e-6, rtol=1e-6)

    print("KERNEL_OK")
</pallas_src>

<mosaic_0001>
module attributes {stable_mosaic.version = 11 : i64} {
  func.func @_mul_vec_bias_kernel(%arg0: i32, %arg1: i32, %arg2: memref<4x512xf32, #tpu.memory_space<vmem>>, %arg3: memref<2x512xf32, #tpu.memory_space<vmem>>, %arg4: memref<4x512xf32, #tpu.memory_space<vmem>>) attributes {dimension_semantics = [#tpu.dimension_semantics<parallel>, #tpu.dimension_semantics<parallel>], iteration_bounds = array<i64: 1, 1>, scalar_prefetch = 0 : i64, scratch_operands = 0 : i64, tpu.core_type = #tpu.core_type<tc>, window_params = [{transform_indices = @transform_0, window_bounds = array<i64: 4, 512>}, {transform_indices = @transform_1, window_bounds = array<i64: 2, 512>}, {transform_indices = @transform_2, window_bounds = array<i64: 4, 512>}]} {
    %c1 = arith.constant 1 : index
    %c0 = arith.constant 0 : index
    %0 = vector.load %arg3[%c1, %c0] : memref<2x512xf32, #tpu.memory_space<vmem>>, vector<1x512xf32>
    %c0_0 = arith.constant 0 : index
    %c0_1 = arith.constant 0 : index
    %1 = vector.load %arg2[%c0_0, %c0_1] : memref<4x512xf32, #tpu.memory_space<vmem>>, vector<4x512xf32>
    %c0_2 = arith.constant 0 : index
    %c0_3 = arith.constant 0 : index
    %2 = vector.load %arg3[%c0_2, %c0_3] : memref<2x512xf32, #tpu.memory_space<vmem>>, vector<1x512xf32>
    %3 = vector.broadcast %2 : vector<1x512xf32> to vector<4x512xf32>
    %4 = arith.mulf %1, %3 : vector<4x512xf32>
    %5 = vector.broadcast %0 : vector<1x512xf32> to vector<4x512xf32>
    %6 = arith.addf %5, %4 : vector<4x512xf32>
    %c0_4 = arith.constant 0 : index
    %c0_5 = arith.constant 0 : index
    %7 = vector.load %arg4[%c0_4, %c0_5] : memref<4x512xf32, #tpu.memory_space<vmem>>, vector<4x512xf32>
    tpu.vector_store %arg4[%c0_4, %c0_5], %6 {strides = array<i32>} : memref<4x512xf32, #tpu.memory_space<vmem>>, vector<4x512xf32>,
    return
  }
  func.func @transform_0(%arg0: i32, %arg1: i32) -> (i32, i32) {
    %c0_i32 = arith.constant 0 : i32
    return %arg1, %arg0 : i32, i32
  }
  func.func @transform_1(%arg0: i32, %arg1: i32) -> (i32, i32) {
    %c0_i32 = arith.constant 0 : i32
    %c0_i32_0 = arith.constant 0 : i32
    return %c0_i32, %arg0 : i32, i32
  }
  func.func @transform_2(%arg0: i32, %arg1: i32) -> (i32, i32) {
    %c0_i32 = arith.constant 0 : i32
    return %arg1, %arg0 : i32, i32
  }
}

</mosaic_0001>

<bundles_post_ra>
// kernel: tile.13
= control target key start
LH: loop header
LB: loop body
LE: loop exit
PB: predicated region body
PF: predicated region fallthrough
CT: control target
= control target key end

     0   :  { %s22_s0 = inlined_call_operand.vmem [shape: f32[128], index: 0, kind: input, shape index: {}]   ;;  %s23_s1 = inlined_call_operand.vmem [shape: f32[4,128], index: 1, kind: output, shape index: {}]  }
   0x1   :  { %v4_v0 = vld [vmem:[%s22_s0] ss:$0 sm:$0xff] }
   0x2   :  { %5 = vst [vmem:[%s23_s1] sm:$0xf] %v4_v0 }

// kernel: mul_forward.1
= control target key start
LH: loop header
LB: loop body
LE: loop exit
PB: predicated region body
PF: predicated region fallthrough
CT: control target
= control target key end

     0   :  { %v17_v0 = vlaneseq  ;;  %s118_s1 = inlined_call_operand.vmem [shape: f32[2,512], index: 1, kind: input, shape index: {}]   ;;  %s119_s0 = inlined_call_operand.vmem [shape: f32[4,512], index: 0, kind: input, shape index: {}]   ;;  %s120_s2 = inlined_call_operand.vmem [shape: f32[4,512], index: 2, kind: output, shape index: {}]  }
   0x1   :  { %v15_v2 = vld [vmem:[%s118_s1] ss:$2 sm:$0xf]  ;;  %v84_v7 = vld [vmem:[%s118_s1 + $0x1] ss:$2 sm:$0xf] }
   0x2   :  { %v18_v1 = vshrl.u32 %v17_v0, 7  ;;  %v13_v10 = vld [vmem:[%s119_s0] sm:$0xff]  ;;  %v14_v15 = vld [vmem:[%s119_s0 + $0x8] sm:$0xff] }
   0x4   :  { %v19_v3 = vsub.s32 0, %v18_v1  ;;  %v23_v4 = vsub.s32 1, %v18_v1  ;;  %v27_v5 = vsub.s32 2, %v18_v1  ;;  %v31_v6 = vsub.s32 3, %v18_v1 }
   0x6   :  { %v20_v8 = vrot.slane %v15_v2, %v19_v3  ;;  %v24_v9 = vrot.slane %v15_v2, %v23_v4  ;;  %v28_v11 = vrot.slane %v15_v2, %v27_v5  ;;  %v32_v12 = vrot.slane %v15_v2, %v31_v6 }
   0x7   :  { %v43_v14 = vrot.slane %v84_v7, %v19_v3  ;;  %v51_v17 = vrot.slane %v84_v7, %v27_v5  ;;  %v47_v19 = vrot.slane %v84_v7, %v23_v4  ;;  %v55_v21 = vrot.slane %v84_v7, %v31_v6 }
   0x8   :  { %v33_v13 = vcombine.low %v20_v8, %v24_v9  ;;  %v34_v16 = vcombine.low %v28_v11, %v32_v12 }
   0xa   :  { %v37_v18 = vmul.f32 %v33_v13, %v13_v10  ;;  %v38_v20 = vmul.f32 %v34_v16, %v14_v15 }
   0xc   :  { %v62_v22 = vcombine.high %v37_v18, %v37_v18  ;;  %v66_v23 = vadd.f32 %v43_v14, %v37_v18  ;;  %v63_v24 = vcombine.high %v38_v20, %v38_v20  ;;  %v68_v25 = vadd.f32 %v51_v17, %v38_v20 }
   0xe   :  { %v67_v26 = vadd.f32 %v62_v22, %v47_v19  ;;  %v69_v27 = vadd.f32 %v63_v24, %v55_v21 }
  0x10   :  { %v74_v28 = vcombine.low %v66_v23, %v67_v26  ;;  %v75_v29 = vcombine.low %v68_v25, %v69_v27 }
  0x12   :  { %78 = vst [vmem:[%s120_s2] sm:$0xff] %v74_v28  ;;  %79 = vst [vmem:[%s120_s2 + $0x8] sm:$0xff] %v75_v29 }

</bundles_post_ra>
